<compile_context>
chip_gen: v7x
topology: tpu7x:2x2x1
jax: 0.10.0
libtpu: 0.0.40
codegen_flags: <defaults>
</compile_context>

<pallas_src>
import jax
import jax.numpy as jnp
from jax.experimental import pallas as pl
from jax.experimental.pallas import tpu as pltpu


def _round_up(x, m):
    return ((x + m - 1) // m) * m


def embed_branch_kernel(x_ref, w1_ref, b1_ref, w2_ref, b2_ref, o_ref):
    # fc1: (TB, Fp) bf16 @ (Fp, Ep) bf16 -> f32 accumulation on the MXU.
    h = jnp.dot(x_ref[...], w1_ref[...], preferred_element_type=jnp.float32)
    h = jnp.maximum(h + b1_ref[...], 0.0)          # bias + ReLU in f32

    # fc2: re-quantize activations to bf16 for the MXU, accumulate in f32.
    h = jnp.dot(h.astype(jnp.bfloat16), w2_ref[...],
                preferred_element_type=jnp.float32)
    h = jnp.maximum(h + b2_ref[...], 0.0)

    # L2 normalize along the feature (lane) axis. torch eps=1e-12 on the norm
    # == clamping the squared norm at 1e-24; rsqrt runs on the (otherwise
    # idle) EUP slot instead of sqrt + per-lane divide.
    sq = jnp.sum(h * h, axis=-1, keepdims=True)
    o_ref[...] = (h * jax.lax.rsqrt(jnp.maximum(sq, 1e-24))).astype(o_ref.dtype)


def fold_bn_into_linear(w, b, gamma, beta, running_mean, running_var, eps=1e-5):
    """Fold eval-mode BatchNorm1d into a preceding Linear layer.

    w: (f_out, f_in) PyTorch layout, b: (f_out,)
    Returns (w_folded_T, b_folded) with w_folded_T of shape (f_in, f_out).
    """
    scale = gamma / jnp.sqrt(running_var + eps)          # (f_out,)
    w_folded = w * scale[:, None]                        # (f_out, f_in)
    b_folded = (b - running_mean) * scale + beta         # (f_out,)
    return w_folded.T, b_folded


def prepare_embed_branch_params(folded, feat_dim, embedding_dim):
    """One-time weight prep: pad feature dims to lane multiples (128) and cast
    weights to bf16. Done once, NOT per forward call. Zero padding is exact:
    padded contraction columns contribute 0, padded output columns stay 0
    through bias(0)+ReLU and drop out of the L2 norm."""
    F, E = feat_dim, embedding_dim
    Fp = _round_up(max(F, 128), 128)
    Ep = _round_up(max(E, 128), 128)
    w1p = jnp.zeros((Fp, Ep), jnp.bfloat16).at[:F, :E].set(
        folded["w1t"].astype(jnp.bfloat16))
    w2p = jnp.zeros((Ep, Ep), jnp.bfloat16).at[:E, :E].set(
        folded["w2t"].astype(jnp.bfloat16))
    b1p = jnp.zeros((1, Ep), jnp.float32).at[0, :E].set(
        folded["b1"].astype(jnp.float32))
    b2p = jnp.zeros((1, Ep), jnp.float32).at[0, :E].set(
        folded["b2"].astype(jnp.float32))
    return {"w1p": w1p, "b1p": b1p, "w2p": w2p, "b2p": b2p,
            "feat_dim": F, "embedding_dim": E}


def _vmem_ceiling_bytes():
    """~7/8 of physical per-core VMEM: ~56 MiB on v7x, ~112 MiB on v5e/v6e."""
    try:
        cap = pltpu.get_tpu_info().vmem_capacity_bytes
    except Exception:
        cap = 64 << 20  # conservative fallback (v7x-sized)
    return (cap * 7) // 8


def embed_branch_forward(x, prepared, *, block_b=256, out_dtype=jnp.float32):
    w1p, b1p = prepared["w1p"], prepared["b1p"]
    w2p, b2p = prepared["w2p"], prepared["b2p"]
    F, E = prepared["feat_dim"], prepared["embedding_dim"]
    Fp, Ep = w1p.shape
    B = x.shape[0]
    assert x.shape[1] == F

    # Batch tile: multiple of 16 (bf16 sublane packing). Guarantee >= 2 grid
    # steps whenever the batch is large enough to split, so the "parallel"
    # axis can shard across v7x's two TensorCores; cap the tile near the real
    # batch to limit zero-row waste.
    Bp16 = _round_up(max(B, 16), 16)
    TB = min(_round_up(block_b, 16), Bp16)
    if Bp16 // TB < 2 and Bp16 >= 32:
        TB = _round_up((Bp16 + 1) // 2, 16)
    Bp = _round_up(Bp16, TB)
    grid = (Bp // TB,)

    # Only materialize a padded x copy when the shape actually needs it.
    if (Bp != B) or (Fp != F):
        xp = jnp.zeros((Bp, Fp), jnp.bfloat16).at[:B, :F].set(
            x.astype(jnp.bfloat16))
    else:
        xp = x.astype(jnp.bfloat16)

    out_bytes = jnp.dtype(out_dtype).itemsize

    # VMEM budget: single-buffered resident bf16 weights + f32 biases,
    # double-buffered x (bf16) / out tiles, plus two (TB, Ep) f32
    # intermediates in the body.
    need = ((Fp * Ep + Ep * Ep) * 2           # weights, Buffered(1)
            + 2 * Ep * 4                      # biases, Buffered(1)
            + 2 * (TB * Fp * 2)               # x tile, double-buffered
            + 2 * (TB * Ep * out_bytes)       # out tile, double-buffered
            + 2 * (TB * Ep * 4))              # f32 intermediates
    ceiling = _vmem_ceiling_bytes()
    vmem_limit = int(min(max(2 * need, 32 << 20), ceiling))

    flops = 2 * Bp * (Fp * Ep + Ep * Ep)
    bytes_accessed = (Bp * Fp * 2 + (Fp * Ep + Ep * Ep) * 2 + 2 * Ep * 4
                      + Bp * Ep * out_bytes)
    cost = pl.CostEstimate(flops=flops, transcendentals=Bp,
                           bytes_accessed=bytes_accessed)

    resident = lambda i: (0, 0)   # weights/biases: one-time DMA, VMEM-resident

    out = pl.pallas_call(
        embed_branch_kernel,
        out_shape=jax.ShapeDtypeStruct((Bp, Ep), out_dtype),
        grid_spec=pltpu.PrefetchScalarGridSpec(
            num_scalar_prefetch=0,
            grid=grid,
            in_specs=[
                pl.BlockSpec((TB, Fp), lambda i: (i, 0)),   # x tile, streamed
                pl.BlockSpec((Fp, Ep), resident,
                             pipeline_mode=pl.Buffered(1)),  # W1 (folded, bf16)
                pl.BlockSpec((1, Ep), resident,
                             pipeline_mode=pl.Buffered(1)),  # b1 (folded, f32)
                pl.BlockSpec((Ep, Ep), resident,
                             pipeline_mode=pl.Buffered(1)),  # W2 (folded, bf16)
                pl.BlockSpec((1, Ep), resident,
                             pipeline_mode=pl.Buffered(1)),  # b2 (folded, f32)
            ],
            out_specs=pl.BlockSpec((TB, Ep), lambda i: (i, 0)),
        ),
        compiler_params=pltpu.CompilerParams(
            dimension_semantics=("parallel",),
            vmem_limit_bytes=vmem_limit,
        ),
        cost_estimate=cost,
    )(xp, w1p, b1p, w2p, b2p)

    if Bp == B and Ep == E:
        return out
    return out[:B, :E]


def make_params(key, feat_dim, embedding_dim):
    ks = jax.random.split(key, 8)
    # Linear 1
    w1 = jax.random.normal(ks[0], (embedding_dim, feat_dim), jnp.float32) * 0.1
    b1 = jax.random.normal(ks[1], (embedding_dim,), jnp.float32) * 0.1
    # BatchNorm 1 (running stats + affine)
    g1 = 1.0 + 0.1 * jax.random.normal(ks[2], (embedding_dim,), jnp.float32)
    be1 = 0.1 * jax.random.normal(ks[3], (embedding_dim,), jnp.float32)
    rm1 = 0.05 * jax.random.normal(ks[4], (embedding_dim,), jnp.float32)
    rv1 = 1.0 + 0.1 * jnp.abs(jax.random.normal(ks[5], (embedding_dim,), jnp.float32))
    # Linear 2
    w2 = jax.random.normal(ks[6], (embedding_dim, embedding_dim), jnp.float32) * 0.1
    b2 = jax.random.normal(ks[7], (embedding_dim,), jnp.float32) * 0.1
    # BatchNorm 2
    g2 = jnp.ones((embedding_dim,), jnp.float32)
    be2 = jnp.zeros((embedding_dim,), jnp.float32)
    rm2 = jnp.zeros((embedding_dim,), jnp.float32)
    rv2 = jnp.ones((embedding_dim,), jnp.float32)

    w1t, b1f = fold_bn_into_linear(w1, b1, g1, be1, rm1, rv1)
    w2t, b2f = fold_bn_into_linear(w2, b2, g2, be2, rm2, rv2)
    return {"w1t": w1t, "b1": b1f, "w2t": w2t, "b2": b2f}


def reference_forward_f32(x, folded):
    """Original full-f32 semantics (BN already folded)."""
    h = jnp.maximum(x @ folded["w1t"] + folded["b1"], 0.0)
    h = jnp.maximum(h @ folded["w2t"] + folded["b2"], 0.0)
    n = jnp.sqrt(jnp.sum(h * h, axis=-1, keepdims=True))
    return h / jnp.maximum(n, 1e-12)


def reference_forward_bf16(x, folded):
    """Mirrors the kernel's bf16-storage / f32-accumulation numerics."""
    w1 = folded["w1t"].astype(jnp.bfloat16)
    w2 = folded["w2t"].astype(jnp.bfloat16)
    h = jnp.dot(x.astype(jnp.bfloat16), w1, preferred_element_type=jnp.float32)
    h = jnp.maximum(h + folded["b1"], 0.0)
    h = jnp.dot(h.astype(jnp.bfloat16), w2, preferred_element_type=jnp.float32)
    h = jnp.maximum(h + folded["b2"], 0.0)
    sq = jnp.sum(h * h, axis=-1, keepdims=True)
    return h * jax.lax.rsqrt(jnp.maximum(sq, 1e-24))


if __name__ == "__main__":
    B, FEAT_DIM, EMBED_DIM = 4, 16, 32
    key = jax.random.PRNGKey(0)
    kx, kp = jax.random.split(key)
    x = jax.random.normal(kx, (B, FEAT_DIM), jnp.float32)

    folded = make_params(kp, FEAT_DIM, EMBED_DIM)
    # One-time parameter preparation (pad + bf16 cast), hoisted out of the
    # per-call forward.
    prepared = prepare_embed_branch_params(folded, FEAT_DIM, EMBED_DIM)

    out = jax.block_until_ready(embed_branch_forward(x, prepared))
    assert out.shape == (B, EMBED_DIM)

    # Tight check against a reference with identical bf16/f32 mixed precision.
    ref_bf16 = reference_forward_bf16(x, folded)
    assert jnp.allclose(out, ref_bf16, atol=1e-5, rtol=1e-5), "mismatch vs bf16 reference"
    # Loose check against the pure-f32 torch-equivalent semantics.
    ref_f32 = reference_forward_f32(x, folded)
    assert jnp.allclose(out, ref_f32, atol=3e-2, rtol=3e-2), "drift vs f32 reference"

    print("KERNEL_OK")
</pallas_src>

<mosaic_0001>
module attributes {stable_mosaic.version = 11 : i64} {
  func.func @embed_branch_kernel(%arg0: i32, %arg1: memref<16x128xbf16, #tpu.memory_space<vmem>>, %arg2: memref<128x128xbf16, #tpu.memory_space<vmem>>, %arg3: memref<1x128xf32, #tpu.memory_space<vmem>>, %arg4: memref<128x128xbf16, #tpu.memory_space<vmem>>, %arg5: memref<1x128xf32, #tpu.memory_space<vmem>>, %arg6: memref<16x128xf32, #tpu.memory_space<vmem>>) attributes {dimension_semantics = [#tpu.dimension_semantics<parallel>], iteration_bounds = array<i64: 1>, scalar_prefetch = 0 : i64, scratch_operands = 0 : i64, tpu.core_type = #tpu.core_type<tc>, window_params = [{transform_indices = @transform_0, window_bounds = array<i64: 16, 128>}, {pipeline_mode = #tpu.pipeline_mode<synchronous>, transform_indices = @transform_1, window_bounds = array<i64: 128, 128>}, {pipeline_mode = #tpu.pipeline_mode<synchronous>, transform_indices = @transform_2, window_bounds = array<i64: 1, 128>}, {pipeline_mode = #tpu.pipeline_mode<synchronous>, transform_indices = @transform_3, window_bounds = array<i64: 128, 128>}, {pipeline_mode = #tpu.pipeline_mode<synchronous>, transform_indices = @transform_4, window_bounds = array<i64: 1, 128>}, {transform_indices = @transform_5, window_bounds = array<i64: 16, 128>}]} {
    %c0 = arith.constant 0 : index
    %c0_0 = arith.constant 0 : index
    %0 = vector.load %arg1[%c0, %c0_0] : memref<16x128xbf16, #tpu.memory_space<vmem>>, vector<16x128xbf16>
    %c0_1 = arith.constant 0 : index
    %c0_2 = arith.constant 0 : index
    %1 = vector.load %arg2[%c0_1, %c0_2] : memref<128x128xbf16, #tpu.memory_space<vmem>>, vector<128x128xbf16>
    %cst = arith.constant dense<0.000000e+00> : vector<16x128xf32>
    %2 = tpu.matmul %0, %1, %cst {dimension_numbers = #tpu.dot_dimension_numbers<[1], [0], [0], [1], [0, 0, 1, 1], [], []>} : vector<16x128xbf16>, vector<128x128xbf16>, vector<16x128xf32> -> vector<16x128xf32>
    %c0_3 = arith.constant 0 : index
    %c0_4 = arith.constant 0 : index
    %3 = vector.load %arg3[%c0_3, %c0_4] : memref<1x128xf32, #tpu.memory_space<vmem>>, vector<1x128xf32>
    %4 = vector.broadcast %3 : vector<1x128xf32> to vector<16x128xf32>
    %5 = arith.addf %2, %4 : vector<16x128xf32>
    %cst_5 = arith.constant 0.000000e+00 : f32
    %6 = vector.broadcast %cst_5 : f32 to vector<16x128xf32>
    %7 = arith.maximumf %5, %6 : vector<16x128xf32>
    %8 = arith.truncf %7 : vector<16x128xf32> to vector<16x128xbf16>
    %c0_6 = arith.constant 0 : index
    %c0_7 = arith.constant 0 : index
    %9 = vector.load %arg4[%c0_6, %c0_7] : memref<128x128xbf16, #tpu.memory_space<vmem>>, vector<128x128xbf16>
    %cst_8 = arith.constant dense<0.000000e+00> : vector<16x128xf32>
    %10 = tpu.matmul %8, %9, %cst_8 {dimension_numbers = #tpu.dot_dimension_numbers<[1], [0], [0], [1], [0, 0, 1, 1], [], []>} : vector<16x128xbf16>, vector<128x128xbf16>, vector<16x128xf32> -> vector<16x128xf32>
    %c0_9 = arith.constant 0 : index
    %c0_10 = arith.constant 0 : index
    %11 = vector.load %arg5[%c0_9, %c0_10] : memref<1x128xf32, #tpu.memory_space<vmem>>, vector<1x128xf32>
    %12 = vector.broadcast %11 : vector<1x128xf32> to vector<16x128xf32>
    %13 = arith.addf %10, %12 : vector<16x128xf32>
    %cst_11 = arith.constant 0.000000e+00 : f32
    %14 = vector.broadcast %cst_11 : f32 to vector<16x128xf32>
    %15 = arith.maximumf %13, %14 : vector<16x128xf32>
    %16 = arith.mulf %15, %15 : vector<16x128xf32>
    %cst_12 = arith.constant dense<0.000000e+00> : vector<16xf32>
    %17 = vector.multi_reduction <add>, %16, %cst_12 [1] : vector<16x128xf32> to vector<16xf32>
    %18 = vector.shape_cast %17 : vector<16xf32> to vector<16x1xf32>
    %cst_13 = arith.constant 1.000000e-24 : f32
    %19 = vector.broadcast %cst_13 : f32 to vector<16x1xf32>
    %20 = arith.maximumf %18, %19 : vector<16x1xf32>
    %21 = math.rsqrt %20 : vector<16x1xf32>
    %22 = vector.broadcast %21 : vector<16x1xf32> to vector<16x128xf32>
    %23 = arith.mulf %15, %22 : vector<16x128xf32>
    %c0_14 = arith.constant 0 : index
    %c0_15 = arith.constant 0 : index
    %24 = vector.load %arg6[%c0_14, %c0_15] : memref<16x128xf32, #tpu.memory_space<vmem>>, vector<16x128xf32>
    tpu.vector_store %arg6[%c0_14, %c0_15], %23 {strides = array<i32>} : memref<16x128xf32, #tpu.memory_space<vmem>>, vector<16x128xf32>,
    return
  }
  func.func @transform_0(%arg0: i32) -> (i32, i32) {
    %c0_i32 = arith.constant 0 : i32
    %c0_i32_0 = arith.constant 0 : i32
    return %arg0, %c0_i32 : i32, i32
  }
  func.func @transform_1(%arg0: i32) -> (i32, i32) {
    %c0_i32 = arith.constant 0 : i32
    %c0_i32_0 = arith.constant 0 : i32
    %c0_i32_1 = arith.constant 0 : i32
    return %c0_i32, %c0_i32_0 : i32, i32
  }
  func.func @transform_2(%arg0: i32) -> (i32, i32) {
    %c0_i32 = arith.constant 0 : i32
    %c0_i32_0 = arith.constant 0 : i32
    %c0_i32_1 = arith.constant 0 : i32
    return %c0_i32, %c0_i32_0 : i32, i32
  }
  func.func @transform_3(%arg0: i32) -> (i32, i32) {
    %c0_i32 = arith.constant 0 : i32
    %c0_i32_0 = arith.constant 0 : i32
    %c0_i32_1 = arith.constant 0 : i32
    return %c0_i32, %c0_i32_0 : i32, i32
  }
  func.func @transform_4(%arg0: i32) -> (i32, i32) {
    %c0_i32 = arith.constant 0 : i32
    %c0_i32_0 = arith.constant 0 : i32
    %c0_i32_1 = arith.constant 0 : i32
    return %c0_i32, %c0_i32_0 : i32, i32
  }
  func.func @transform_5(%arg0: i32) -> (i32, i32) {
    %c0_i32 = arith.constant 0 : i32
    %c0_i32_0 = arith.constant 0 : i32
    return %arg0, %c0_i32 : i32, i32
  }
}

</mosaic_0001>

<bundles_post_ra>
// kernel: tpu_custom_call.1
= control target key start
LH: loop header
LB: loop body
LE: loop exit
PB: predicated region body
PF: predicated region fallthrough
CT: control target
= control target key end

     0   :  { %10 = vsyncpa [#allocation3], 0  ;;  %s644_s0 = inlined_call_operand.hbm [shape: bf16[16,128], index: 0, kind: input, shape index: {}]   ;;  %s645_s1 = inlined_call_operand.hbm [shape: bf16[128,128], index: 1, kind: input, shape index: {}]   ;;  %s646_s2 = inlined_call_operand.vmem [shape: f32[1,128], index: 2, kind: input, shape index: {}]   ;;  %s647_s3 = inlined_call_operand.hbm [shape: bf16[128,128], index: 3, kind: input, shape index: {}]   ;;  %s648_s4 = inlined_call_operand.vmem [shape: f32[1,128], index: 4, kind: input, shape index: {}]   ;;  %s649_s5 = inlined_call_operand.hbm [shape: f32[16,128], index: 5, kind: output, shape index: {}]  }
   0x1   :  { %11 = vsyncpa [#allocation6], 0 }
   0x2   :  { %12 = vsyncpa [#allocation4], 0  ;;  %s534_s18 = smov [#allocation5]   ;;  %s535_s20 = smov [#allocation2]  }
   0x3   :  { %s30_s19 = sshll.u32 %s534_s18, 4  ;;  %s18_s21 = sshll.u32 %s535_s20, 4  ;;  %s31_s19 = int_to_ptr.vmem [resolvable:$true] %s30_s19  ;;  %s574_s21 = int_to_ptr.vmem [resolvable:$true] %s18_s21 }
   0x4   :  { %s440_s24 = scalar_lea.hbm %s645_s1, 1024 }
   0x5   :  { %p441_p0 = scmp.ne.s32.totalorder %s645_s1, %s440_s24  ;;  %p444_p1 = scmp.lt.u32.totalorder %s440_s24, %s645_s1 }
   0x7   :  { %p446_p2 = pnand %p444_p1, %p441_p0 }
   0x9   :  { %449 = shalt.err (!%p446_p2)
}
   0xa   :  { %s450_s29 = scalar_lea.vmem %s31_s19, 1024  ;;  %p455_p4 = scmp.lt.s32.totalorder %s31_s19, %s31_s19 }
   0xb   :  { %p451_p3 = scmp.ne.s32.totalorder %s31_s19, %s450_s29  ;;  %p456_p5 = scmp.lt.s32.totalorder %s450_s29, %s450_s29 }
   0xd   :  { %p457_p6 = por %p456_p5, %p455_p4 }
   0xf   :  { %p458_p7 = pnand %p457_p6, %p451_p3 }
  0x11   :  { %461 = shalt.err (!%p458_p7)
}
  0x12   :  { %s536_s30 = smov 64   ;;  %s537_s6 = smov 4  }
  0x13   :  { %36 = dma.hbm_to_vmem [thread:$0]  %s645_s1, 1024, %s31_s19, [#allocation6], %s536_s30, %s536_s30, %s537_s6  }
  0x14   :  { %s462_s11 = scalar_lea.hbm %s644_s0, 128 }
  0x15   :  { %p463_p8 = scmp.ne.s32.totalorder %s644_s0, %s462_s11  ;;  %p466_p9 = scmp.lt.u32.totalorder %s462_s11, %s644_s0 }
  0x17   :  { %p468_p10 = pnand %p466_p9, %p463_p8 }
  0x19   :  { %471 = shalt.err (!%p468_p10)
}
  0x1a   :  { %s472_s16 = scalar_lea.vmem %s574_s21, 128  ;;  %p477_p12 = scmp.lt.s32.totalorder %s574_s21, %s574_s21 }
  0x1b   :  { %p473_p11 = scmp.ne.s32.totalorder %s574_s21, %s472_s16  ;;  %p478_p13 = scmp.lt.s32.totalorder %s472_s16, %s472_s16 }
  0x1d   :  { %p479_p0 = por %p478_p13, %p477_p12 }
  0x1f   :  { %p480_p1 = pnand %p479_p0, %p473_p11 }
  0x21   :  { %483 = shalt.err (!%p480_p1)
}
  0x22   :  { %24 = dma.hbm_to_vmem [thread:$0]  %s644_s0, 128, %s574_s21, [#allocation3], %s536_s30, %s536_s30, %s537_s6  }
  0x23   :  { %s538_s18 = smov [#allocation7]   ;;  %s484_s23 = scalar_lea.hbm %s647_s3, 1024 }
  0x24   :  { %s44_s19 = sshll.u32 %s538_s18, 4  ;;  %p485_p2 = scmp.ne.s32.totalorder %s647_s3, %s484_s23  ;;  %s45_s19 = int_to_ptr.vmem [resolvable:$true] %s44_s19 }
  0x25   :  { %p488_p3 = scmp.lt.u32.totalorder %s484_s23, %s647_s3 }
  0x27   :  { %p490_p4 = pnand %p488_p3, %p485_p2 }
  0x29   :  { %493 = shalt.err (!%p490_p4)
}
  0x2a   :  { %s494_s28 = scalar_lea.vmem %s45_s19, 1024  ;;  %p499_p6 = scmp.lt.s32.totalorder %s45_s19, %s45_s19 }
  0x2b   :  { %p495_p5 = scmp.ne.s32.totalorder %s45_s19, %s494_s28  ;;  %p500_p7 = scmp.lt.s32.totalorder %s494_s28, %s494_s28 }
  0x2d   :  { %p501_p8 = por %p500_p7, %p499_p6 }
  0x2f   :  { %p502_p9 = pnand %p501_p8, %p495_p5 }
  0x31   :  { %505 = shalt.err (!%p502_p9)
}
  0x32   :  { %50 = dma.hbm_to_vmem [thread:$0]  %s647_s3, 1024, %s45_s19, [#allocation6], %s536_s30, %s536_s30, %s537_s6  }
  0x33   :  { %528 = dma.done.wait [#allocation3], 128  }
  0x34   :  { %529 = vsyncadd [#allocation3], 4294967168 }
  0x35   :  { %530 = dma.done.wait [#allocation6], 2048  }
  0x36   :  { %531 = vsyncadd [#allocation6], 4294965248  ;;  %v539_v0 = vmov 0.0   ;;  %vm540_vm0 = vmmov 0   ;;  %v419_v1 = vld [vmem:[#allocation5] sm:$0xff]   ;;  %v420_v2 = vld [vmem:[#allocation5 + $0x8] sm:$0xff]  }
  0x37   :  { %369 = vmatprep.subr.bf16.mxu0 %v539_v0  ;;  %385 = vmatprep.mubr.msk.bf16.mxu0 %vm540_vm0, %v539_v0  ;;  %v421_v3 = vld [vmem:[#allocation5 + $0x10] sm:$0xff]   ;;  %v428_v4 = vld [vmem:[#allocation7] sm:$0xff]   ;;  %v422_v5 = vld [vmem:[#allocation5 + $0x18] sm:$0xff]  }
  0x38   :  { %389 = vmatprep.subr.bf16.mxu1 %v539_v0  ;;  %405 = vmatprep.mubr.msk.bf16.mxu1 %vm540_vm0, %v539_v0  ;;  %v429_v6 = vld [vmem:[#allocation7 + $0x8] sm:$0xff]   ;;  %v423_v7 = vld [vmem:[#allocation5 + $0x20] sm:$0xff]   ;;  %v430_v8 = vld [vmem:[#allocation7 + $0x10] sm:$0xff]  }
  0x39   :  { %370 = vmatpush3.bf16.msra.mxu0 %v419_v1  ;;  %390 = vmatpush3.bf16.msra.mxu1 %v428_v4  ;;  %v424_v9 = vld [vmem:[#allocation5 + $0x28] sm:$0xff]   ;;  %v431_v10 = vld [vmem:[#allocation7 + $0x18] sm:$0xff]   ;;  %v425_v11 = vld [vmem:[#allocation5 + $0x30] sm:$0xff]  }
  0x3a   :  { %371 = vmatprep.subr.bf16.mxu0 %v539_v0  ;;  %391 = vmatprep.subr.bf16.mxu1 %v539_v0  ;;  %v432_v12 = vld [vmem:[#allocation7 + $0x20] sm:$0xff]   ;;  %v426_v13 = vld [vmem:[#allocation5 + $0x38] sm:$0xff]   ;;  %v433_v14 = vld [vmem:[#allocation7 + $0x28] sm:$0xff]  }
  0x3b   :  { %v427_v15 = vld [vmem:[#allocation2] sm:$0xff]   ;;  %v434_v16 = vld [vmem:[#allocation7 + $0x30] sm:$0xff]  }
  0x3c   :  { %v435_v17 = vld [vmem:[#allocation7 + $0x38] sm:$0xff]  }
  0x3d   :  { %372 = vmatpush3.bf16.msra.mxu0 %v420_v2  ;;  %392 = vmatpush3.bf16.msra.mxu1 %v429_v6  ;;  %v332_v18 = vld [vmem:[%s646_s2] ss:$0 sm:$0xff]  ;;  %s541_s2 = smov [#allocation8]  }
  0x3e   :  { %373 = vmatprep.subr.bf16.mxu0 %v539_v0  ;;  %393 = vmatprep.subr.bf16.mxu1 %v539_v0  ;;  %v342_v28 = vld [vmem:[%s648_s4] ss:$0 sm:$0xff]  ;;  %s319_s4 = sshll.u32 %s541_s2, 4  ;;  %s320_s4 = int_to_ptr.vmem [resolvable:$true] %s319_s4 }
  0x3f   :  { %s506_s7 = scalar_lea.vmem %s320_s4, 256  ;;  %p511_p11 = scmp.lt.s32.totalorder %s320_s4, %s320_s4 }
  0x40   :  { %p507_p10 = scmp.ne.s32.totalorder %s320_s4, %s506_s7  ;;  %p512_p12 = scmp.lt.s32.totalorder %s506_s7, %s506_s7 }
  0x41   :  { %374 = vmatpush3.bf16.msra.mxu0 %v421_v3  ;;  %394 = vmatpush3.bf16.msra.mxu1 %v430_v8 }
  0x42   :  { %375 = vmatprep.subr.bf16.mxu0 %v539_v0  ;;  %395 = vmatprep.subr.bf16.mxu1 %v539_v0  ;;  %p513_p13 = por %p512_p12, %p511_p11 }
  0x44   :  { %p514_p0 = pnand %p513_p13, %p507_p10 }
  0x45   :  { %376 = vmatpush3.bf16.msra.mxu0 %v422_v5  ;;  %396 = vmatpush3.bf16.msra.mxu1 %v431_v10 }
  0x46   :  { %377 = vmatprep.subr.bf16.mxu0 %v539_v0  ;;  %397 = vmatprep.subr.bf16.mxu1 %v539_v0 }
  0x49   :  { %378 = vmatpush3.bf16.msra.mxu0 %v423_v7  ;;  %398 = vmatpush3.bf16.msra.mxu1 %v432_v12 }
  0x4a   :  { %379 = vmatprep.subr.bf16.mxu0 %v539_v0  ;;  %399 = vmatprep.subr.bf16.mxu1 %v539_v0 }
  0x4d   :  { %380 = vmatpush3.bf16.msra.mxu0 %v424_v9  ;;  %400 = vmatpush3.bf16.msra.mxu1 %v433_v14 }
  0x4e   :  { %381 = vmatprep.subr.bf16.mxu0 %v539_v0  ;;  %401 = vmatprep.subr.bf16.mxu1 %v539_v0 }
  0x51   :  { %382 = vmatpush3.bf16.msra.mxu0 %v425_v11  ;;  %402 = vmatpush3.bf16.msra.mxu1 %v434_v16 }
  0x52   :  { %383 = vmatprep.subr.bf16.mxu0 %v539_v0  ;;  %403 = vmatprep.subr.bf16.mxu1 %v539_v0 }
  0x55   :  { %384 = vmatpush3.bf16.msra.mxu0 %v426_v13  ;;  %404 = vmatpush3.bf16.msra.mxu1 %v435_v17 }
  0x58   :  { %386 = vmatmul.mubr.bf16.vlgmr.msra.gmra.mrb[0].mxu0 %v427_v15 }
 0x12b   :  { %v176_v19 = vpop.f32.mrb[0].mxu0 }
 0x12c   :  { %v177_v20 = vadd.f32 %v332_v18, %v176_v19  ;;  %v387_v21 = vpop.f32.mrb[1].mxu0 }
 0x12d   :  { %v179_v22 = vpop.f32.mrb[2].mxu0 }
 0x12e   :  { %v180_v23 = vadd.f32 %v332_v18, %v179_v22  ;;  %v388_v24 = vpop.f32.mrb[3].mxu0  ;;  %v183_v25 = vmax.f32 %v177_v20, 0.0 }
 0x130   :  { %v184_v26 = vmax.f32 %v180_v23, 0.0 }
 0x132   :  { %v185_v27 = vpack.c.bf16 %v184_v26, %v183_v25 }
 0x134   :  { %406 = vmatmul.mubr.bf16.vlgmr.msra.gmra.mrb[0].mxu1 %v185_v27 }
 0x207   :  { %v291_v29 = vpop.f32.mrb[0].mxu1 }
 0x208   :  { %v292_v30 = vadd.f32 %v342_v28, %v291_v29  ;;  %v407_v31 = vpop.f32.mrb[1].mxu1 }
 0x209   :  { %v294_v32 = vpop.f32.mrb[2].mxu1 }
 0x20a   :  { %v298_v33 = vmax.f32 %v292_v30, 0.0  ;;  %v295_v34 = vadd.f32 %v342_v28, %v294_v32  ;;  %v408_v35 = vpop.f32.mrb[3].mxu1 }
 0x20c   :  { %v299_v36 = vmax.f32 %v295_v34, 0.0  ;;  %v300_v37 = vmul.f32 %v298_v33, %v298_v33 }
 0x20e   :  { %302 = vadd.xlane.f32.xlu0 %v300_v37  ;;  %v301_v38 = vmul.f32 %v299_v36, %v299_v36 }
 0x212   :  { %304 = vadd.xlane.f32.xlu0 %v301_v38 }
 0x29b   :  { %v303_v39 = vpop.xlane.xlu0 %302 }
 0x29c   :  { %v306_v40 = vmax.f32 %v303_v39, 1e-24 }
 0x29e   :  { %436 = vrsqrt.f32 %v306_v40 }
 0x29f   :  { %v305_v41 = vpop.xlane.xlu0 %304 }
 0x2a0   :  { %v307_v42 = vmax.f32 %v305_v41, 1e-24 }
 0x2a2   :  { %438 = vrsqrt.f32 %v307_v42 }
 0x2a8   :  { %v437_v43 = vpop.eup %436 }
 0x2a9   :  { %v310_v44 = vmul.f32 %v437_v43, %v298_v33 }
 0x2ab   :  { %312 = vst [vmem:[#allocation8] sm:$0xff] %v310_v44 }
 0x2ac   :  { %v439_v45 = vpop.eup %438 }
 0x2ad   :  { %v311_v46 = vmul.f32 %v439_v45, %v299_v36 }
 0x2af   :  { %313 = vst [vmem:[#allocation8 + $0x8] sm:$0xff] %v311_v46 }
 0x2b0   :  { %517 = shalt.err (!%p514_p0)
}
 0x2b1   :  { %s518_s10 = scalar_lea.hbm %s649_s5, 256 }
 0x2b2   :  { %p519_p1 = scmp.ne.s32.totalorder %s649_s5, %s518_s10  ;;  %p522_p2 = scmp.lt.u32.totalorder %s518_s10, %s649_s5 }
 0x2b4   :  { %p524_p3 = pnand %p522_p2, %p519_p1 }
 0x2b6   :  { %527 = shalt.err (!%p524_p3)
}
 0x2b7   :  { %s542_s15 = smov 128   ;;  %s543_s16 = smov 8  }
 0x2b8   :  { %325 = dma.vmem_to_hbm [thread:$0]  %s320_s4, 256, %s649_s5, [#allocation4], %s542_s15, %s542_s15, %s543_s16  }
 0x2b9   :  { %532 = dma.done.wait [#allocation4], 256  }
 0x2ba   :  { %533 = vsyncadd [#allocation4], 4294967040 }
 0x2bb   :  { %329 = vsyncpa [#allocation3], 1 }
 0x2bc   :  { %330 = vsyncpa [#allocation6], 1 }
 0x2bd   :  { %331 = vsyncpa [#allocation4], 1 }

</bundles_post_ra>
